<compile_context>
chip_gen: v6e
topology: v6e:2x2x1
jax: 0.10.0
libtpu: 0.0.40
codegen_flags: <defaults>
</compile_context>

<pallas_src>
import jax
import jax.numpy as jnp
from jax.experimental import pallas as pl
from jax.experimental.pallas import tpu as pltpu


# ---------------------------------------------------------------------------
# Kernel
# ---------------------------------------------------------------------------
def actor_kernel(x_ref, w0_ref, b0_ref, w1_ref, b1_ref, w2_ref, b2_ref, o_ref):
    cd = w0_ref.dtype  # MXU operand dtype (bf16 fast path or f32 exact path)

    # Layer 1: Linear + ReLU (MXU accumulates in f32; epilogue stays f32).
    h = jnp.dot(x_ref[...].astype(cd), w0_ref[...],
                preferred_element_type=jnp.float32)
    h = jnp.maximum(h + b0_ref[...], 0.0)

    # Layer 2: Linear + ReLU.
    h = jnp.dot(h.astype(cd), w1_ref[...], preferred_element_type=jnp.float32)
    h = jnp.maximum(h + b1_ref[...], 0.0)

    # Output layer (lane-padded to a multiple of 128 columns): Linear + tanh.
    y = jnp.dot(h.astype(cd), w2_ref[...], preferred_element_type=jnp.float32)
    o_ref[...] = jnp.tanh(y + b2_ref[...])


# ---------------------------------------------------------------------------
# Wrapper
# ---------------------------------------------------------------------------
def _pick_batch_tile(batch):
    """Batch tile size.

    Single grid step up to 1024 rows: the grid is a sequential loop on v5e/v6e
    (one TensorCore), and for small/medium batches splitting across v7x's two
    TCs duplicates the weight DMA and per-step launch cost for <1 us of work.
    Large batches tile at 1024 rows (multiple of 256 and 16) so v7x's two TCs
    share the "parallel" steps and per-step overhead is amortized.
    """
    if batch <= 1024:
        return batch
    return 1024


def prepare_actor_params(params, *, weights_dtype=jnp.bfloat16):
    """One-time weight preparation: pad the output layer to a lane-dense
    multiple of 128 columns and cast weights to the MXU operand dtype.
    Call once (e.g. at init / after each weight update), NOT per forward."""
    w2, b2 = params["w2"], params["b2"]
    action_size = w2.shape[1]
    n_out = -(-action_size // 128) * 128
    pad = n_out - action_size
    # tanh(x @ 0 + 0) = 0 in the padded columns; they are sliced off later.
    w2p = jnp.pad(w2, ((0, 0), (0, pad)))
    b2p = jnp.pad(b2, ((0, 0), (0, pad)))
    return {
        "w0": jnp.asarray(params["w0"], weights_dtype),
        "w1": jnp.asarray(params["w1"], weights_dtype),
        "w2": jnp.asarray(w2p, weights_dtype),
        "b0": jnp.asarray(params["b0"], jnp.float32),
        "b1": jnp.asarray(params["b1"], jnp.float32),
        "b2": jnp.asarray(b2p, jnp.float32),
        "action_size": action_size,
    }


def actor_forward(state, prepared, *, batch_tile=None):
    """Run the Actor MLP via a single pallas_call.

    state    : (B, state_size) float32
    prepared : output of prepare_actor_params()
    """
    w0, b0 = prepared["w0"], prepared["b0"]
    w1, b1 = prepared["w1"], prepared["b1"]
    w2, b2 = prepared["w2"], prepared["b2"]
    action_size = prepared["action_size"]

    B, state_size = state.shape
    h0 = w0.shape[1]
    h1 = w1.shape[1]
    n_out = w2.shape[1]

    tb = batch_tile if batch_tile is not None else _pick_batch_tile(B)
    grid = (pl.cdiv(B, tb),)

    cost = pl.CostEstimate(
        flops=2 * B * (state_size * h0 + h0 * h1 + h1 * n_out),
        transcendentals=B * n_out,  # tanh
        bytes_accessed=int(
            state.size * state.dtype.itemsize
            + B * n_out * 4
            + sum(int(a.size) * a.dtype.itemsize
                  for a in (w0, b0, w1, b1, w2, b2))
        ),
    )

    def resident(arr):
        # Constant index_map across the grid -> weights/biases stay VMEM-resident.
        return pl.BlockSpec(arr.shape, lambda i: (0, 0))

    out_padded = pl.pallas_call(
        actor_kernel,
        out_shape=jax.ShapeDtypeStruct((B, n_out), jnp.float32),
        grid_spec=pltpu.PrefetchScalarGridSpec(
            num_scalar_prefetch=0,
            grid=grid,
            in_specs=[
                pl.BlockSpec((tb, state_size), lambda i: (i, 0)),
                resident(w0), resident(b0),
                resident(w1), resident(b1),
                resident(w2), resident(b2),
            ],
            out_specs=pl.BlockSpec((tb, n_out), lambda i: (i, 0)),
        ),
        compiler_params=pltpu.CompilerParams(
            dimension_semantics=("parallel",),
        ),
        cost_estimate=cost,
    )(state, w0, b0, w1, b1, w2, b2)

    return out_padded[:, :action_size]


# ---------------------------------------------------------------------------
# Init + pure-JAX reference
# ---------------------------------------------------------------------------
def init_actor_params(key, state_size, action_size, fc_units=(256, 128)):
    """Deterministic init mimicking nn.Linear default (uniform +/- 1/sqrt(fan_in))."""
    dims = [state_size] + list(fc_units) + [action_size]
    params = {}
    for li, (fan_in, fan_out) in enumerate(zip(dims[:-1], dims[1:])):
        key, kw, kb = jax.random.split(key, 3)
        bound = float(fan_in) ** -0.5
        params[f"w{li}"] = jax.random.uniform(
            kw, (fan_in, fan_out), jnp.float32, -bound, bound)
        params[f"b{li}"] = jax.random.uniform(
            kb, (1, fan_out), jnp.float32, -bound, bound)
    return params


def actor_reference(state, params, *, weights_dtype=jnp.bfloat16):
    """Pure-JAX reference mirroring the kernel's dtype path."""
    dt = weights_dtype
    h = jnp.maximum(
        jnp.dot(state.astype(dt), params["w0"].astype(dt),
                preferred_element_type=jnp.float32) + params["b0"], 0.0)
    h = jnp.maximum(
        jnp.dot(h.astype(dt), params["w1"].astype(dt),
                preferred_element_type=jnp.float32) + params["b1"], 0.0)
    y = jnp.dot(h.astype(dt), params["w2"].astype(dt),
                preferred_element_type=jnp.float32) + params["b2"]
    return jnp.tanh(y)


# ---------------------------------------------------------------------------
# Self-test
# ---------------------------------------------------------------------------
if __name__ == "__main__":
    batch = 2
    state_size = 28
    action_size = 4
    fc_units = (256, 128)

    key = jax.random.PRNGKey(0)
    key, k_state = jax.random.split(key)
    state = jax.random.normal(k_state, (batch, state_size), jnp.float32)
    params = init_actor_params(key, state_size, action_size, fc_units)

    # bf16 fast path (weights streamed in bf16, f32 MXU accumulation).
    prep_bf16 = prepare_actor_params(params, weights_dtype=jnp.bfloat16)
    out = jax.block_until_ready(actor_forward(state, prep_bf16))
    assert out.shape == (batch, action_size)
    ref_bf16 = actor_reference(state, params, weights_dtype=jnp.bfloat16)
    ref_f32 = actor_reference(state, params, weights_dtype=jnp.float32)
    assert jnp.allclose(out, ref_bf16, atol=1e-3, rtol=1e-3), "mismatch vs bf16 reference"
    assert jnp.allclose(out, ref_f32, atol=3e-2, rtol=3e-2), "mismatch vs f32 reference"

    # f32 exact path (parity with the PyTorch Actor).
    prep_f32 = prepare_actor_params(params, weights_dtype=jnp.float32)
    out_f32 = jax.block_until_ready(actor_forward(state, prep_f32))
    assert jnp.allclose(out_f32, ref_f32, atol=1e-5, rtol=1e-5), "mismatch vs exact f32 reference"

    # Medium batch: single grid step (no splitting on any generation at B=48).
    key, k_big = jax.random.split(key)
    state_big = jax.random.normal(k_big, (48, state_size), jnp.float32)
    out_big = jax.block_until_ready(actor_forward(state_big, prep_bf16))
    assert out_big.shape == (48, action_size)
    assert jnp.allclose(out_big, actor_reference(state_big, params, weights_dtype=jnp.bfloat16),
                        atol=1e-3, rtol=1e-3), "mismatch on medium-batch path"

    # Exercise the multi-step grid path explicitly via batch_tile override.
    out_tiled = jax.block_until_ready(actor_forward(state_big, prep_bf16, batch_tile=16))
    assert jnp.allclose(out_tiled, out_big, atol=1e-5, rtol=1e-5), "mismatch on tiled grid path"

    print("KERNEL_OK")
</pallas_src>

<mosaic_0001>
module attributes {stable_mosaic.version = 11 : i64} {
  func.func @actor_kernel(%arg0: i32, %arg1: memref<2x28xf32, #tpu.memory_space<vmem>>, %arg2: memref<28x256xbf16, #tpu.memory_space<vmem>>, %arg3: memref<1x256xf32, #tpu.memory_space<vmem>>, %arg4: memref<256x128xbf16, #tpu.memory_space<vmem>>, %arg5: memref<1x128xf32, #tpu.memory_space<vmem>>, %arg6: memref<128x128xbf16, #tpu.memory_space<vmem>>, %arg7: memref<1x128xf32, #tpu.memory_space<vmem>>, %arg8: memref<2x128xf32, #tpu.memory_space<vmem>>) attributes {dimension_semantics = [#tpu.dimension_semantics<parallel>], iteration_bounds = array<i64: 1>, scalar_prefetch = 0 : i64, scratch_operands = 0 : i64, tpu.core_type = #tpu.core_type<tc>, window_params = [{transform_indices = @transform_0, window_bounds = array<i64: 2, 28>}, {pipeline_mode = #tpu.pipeline_mode<synchronous>, transform_indices = @transform_1, window_bounds = array<i64: 28, 256>}, {pipeline_mode = #tpu.pipeline_mode<synchronous>, transform_indices = @transform_2, window_bounds = array<i64: 1, 256>}, {pipeline_mode = #tpu.pipeline_mode<synchronous>, transform_indices = @transform_3, window_bounds = array<i64: 256, 128>}, {pipeline_mode = #tpu.pipeline_mode<synchronous>, transform_indices = @transform_4, window_bounds = array<i64: 1, 128>}, {pipeline_mode = #tpu.pipeline_mode<synchronous>, transform_indices = @transform_5, window_bounds = array<i64: 128, 128>}, {pipeline_mode = #tpu.pipeline_mode<synchronous>, transform_indices = @transform_6, window_bounds = array<i64: 1, 128>}, {transform_indices = @transform_7, window_bounds = array<i64: 2, 128>}]} {
    %c0 = arith.constant 0 : index
    %c0_0 = arith.constant 0 : index
    %0 = vector.load %arg1[%c0, %c0_0] : memref<2x28xf32, #tpu.memory_space<vmem>>, vector<2x28xf32>
    %1 = arith.truncf %0 : vector<2x28xf32> to vector<2x28xbf16>
    %c0_1 = arith.constant 0 : index
    %c0_2 = arith.constant 0 : index
    %2 = vector.load %arg2[%c0_1, %c0_2] : memref<28x256xbf16, #tpu.memory_space<vmem>>, vector<28x256xbf16>
    %cst = arith.constant dense<0.000000e+00> : vector<2x256xf32>
    %3 = tpu.matmul %1, %2, %cst {dimension_numbers = #tpu.dot_dimension_numbers<[1], [0], [0], [1], [0, 0, 1, 1], [], []>} : vector<2x28xbf16>, vector<28x256xbf16>, vector<2x256xf32> -> vector<2x256xf32>
    %c0_3 = arith.constant 0 : index
    %c0_4 = arith.constant 0 : index
    %4 = vector.load %arg3[%c0_3, %c0_4] : memref<1x256xf32, #tpu.memory_space<vmem>>, vector<1x256xf32>
    %5 = vector.broadcast %4 : vector<1x256xf32> to vector<2x256xf32>
    %6 = arith.addf %3, %5 : vector<2x256xf32>
    %cst_5 = arith.constant 0.000000e+00 : f32
    %7 = vector.broadcast %cst_5 : f32 to vector<2x256xf32>
    %8 = arith.maximumf %6, %7 : vector<2x256xf32>
    %9 = arith.truncf %8 : vector<2x256xf32> to vector<2x256xbf16>
    %c0_6 = arith.constant 0 : index
    %c0_7 = arith.constant 0 : index
    %10 = vector.load %arg4[%c0_6, %c0_7] : memref<256x128xbf16, #tpu.memory_space<vmem>>, vector<256x128xbf16>
    %cst_8 = arith.constant dense<0.000000e+00> : vector<2x128xf32>
    %11 = tpu.matmul %9, %10, %cst_8 {dimension_numbers = #tpu.dot_dimension_numbers<[1], [0], [0], [1], [0, 0, 1, 1], [], []>} : vector<2x256xbf16>, vector<256x128xbf16>, vector<2x128xf32> -> vector<2x128xf32>
    %c0_9 = arith.constant 0 : index
    %c0_10 = arith.constant 0 : index
    %12 = vector.load %arg5[%c0_9, %c0_10] : memref<1x128xf32, #tpu.memory_space<vmem>>, vector<1x128xf32>
    %13 = vector.broadcast %12 : vector<1x128xf32> to vector<2x128xf32>
    %14 = arith.addf %11, %13 : vector<2x128xf32>
    %cst_11 = arith.constant 0.000000e+00 : f32
    %15 = vector.broadcast %cst_11 : f32 to vector<2x128xf32>
    %16 = arith.maximumf %14, %15 : vector<2x128xf32>
    %17 = arith.truncf %16 : vector<2x128xf32> to vector<2x128xbf16>
    %c0_12 = arith.constant 0 : index
    %c0_13 = arith.constant 0 : index
    %18 = vector.load %arg6[%c0_12, %c0_13] : memref<128x128xbf16, #tpu.memory_space<vmem>>, vector<128x128xbf16>
    %cst_14 = arith.constant dense<0.000000e+00> : vector<2x128xf32>
    %19 = tpu.matmul %17, %18, %cst_14 {dimension_numbers = #tpu.dot_dimension_numbers<[1], [0], [0], [1], [0, 0, 1, 1], [], []>} : vector<2x128xbf16>, vector<128x128xbf16>, vector<2x128xf32> -> vector<2x128xf32>
    %c0_15 = arith.constant 0 : index
    %c0_16 = arith.constant 0 : index
    %20 = vector.load %arg7[%c0_15, %c0_16] : memref<1x128xf32, #tpu.memory_space<vmem>>, vector<1x128xf32>
    %21 = vector.broadcast %20 : vector<1x128xf32> to vector<2x128xf32>
    %22 = arith.addf %19, %21 : vector<2x128xf32>
    %23 = math.tanh %22 : vector<2x128xf32>
    %c0_17 = arith.constant 0 : index
    %c0_18 = arith.constant 0 : index
    %24 = vector.load %arg8[%c0_17, %c0_18] : memref<2x128xf32, #tpu.memory_space<vmem>>, vector<2x128xf32>
    tpu.vector_store %arg8[%c0_17, %c0_18], %23 {strides = array<i32>} : memref<2x128xf32, #tpu.memory_space<vmem>>, vector<2x128xf32>,
    return
  }
  func.func @transform_0(%arg0: i32) -> (i32, i32) {
    %c0_i32 = arith.constant 0 : i32
    %c0_i32_0 = arith.constant 0 : i32
    return %arg0, %c0_i32 : i32, i32
  }
  func.func @transform_1(%arg0: i32) -> (i32, i32) {
    %c0_i32 = arith.constant 0 : i32
    %c0_i32_0 = arith.constant 0 : i32
    %c0_i32_1 = arith.constant 0 : i32
    return %c0_i32, %c0_i32_0 : i32, i32
  }
  func.func @transform_2(%arg0: i32) -> (i32, i32) {
    %c0_i32 = arith.constant 0 : i32
    %c0_i32_0 = arith.constant 0 : i32
    %c0_i32_1 = arith.constant 0 : i32
    return %c0_i32, %c0_i32_0 : i32, i32
  }
  func.func @transform_3(%arg0: i32) -> (i32, i32) {
    %c0_i32 = arith.constant 0 : i32
    %c0_i32_0 = arith.constant 0 : i32
    %c0_i32_1 = arith.constant 0 : i32
    return %c0_i32, %c0_i32_0 : i32, i32
  }
  func.func @transform_4(%arg0: i32) -> (i32, i32) {
    %c0_i32 = arith.constant 0 : i32
    %c0_i32_0 = arith.constant 0 : i32
    %c0_i32_1 = arith.constant 0 : i32
    return %c0_i32, %c0_i32_0 : i32, i32
  }
  func.func @transform_5(%arg0: i32) -> (i32, i32) {
    %c0_i32 = arith.constant 0 : i32
    %c0_i32_0 = arith.constant 0 : i32
    %c0_i32_1 = arith.constant 0 : i32
    return %c0_i32, %c0_i32_0 : i32, i32
  }
  func.func @transform_6(%arg0: i32) -> (i32, i32) {
    %c0_i32 = arith.constant 0 : i32
    %c0_i32_0 = arith.constant 0 : i32
    %c0_i32_1 = arith.constant 0 : i32
    return %c0_i32, %c0_i32_0 : i32, i32
  }
  func.func @transform_7(%arg0: i32) -> (i32, i32) {
    %c0_i32 = arith.constant 0 : i32
    %c0_i32_0 = arith.constant 0 : i32
    return %arg0, %c0_i32 : i32, i32
  }
}

</mosaic_0001>

<bundles_post_ra>
// kernel: tpu_custom_call.1
= control target key start
LH: loop header
LB: loop body
LE: loop exit
PB: predicated region body
PF: predicated region fallthrough
CT: control target
= control target key end

     0   :  { %12 = vsyncpa [#allocation3], 0  ;;  %s791_s0 = inlined_call_operand.hbm [shape: f32[2,28], index: 0, kind: input, shape index: {}]   ;;  %s792_s1 = inlined_call_operand.hbm [shape: bf16[28,256], index: 1, kind: input, shape index: {}]   ;;  %s793_s2 = inlined_call_operand.vmem [shape: f32[1,256], index: 2, kind: input, shape index: {}]   ;;  %s794_s3 = inlined_call_operand.hbm [shape: bf16[256,128], index: 3, kind: input, shape index: {}]   ;;  %s795_s4 = inlined_call_operand.vmem [shape: f32[1,128], index: 4, kind: input, shape index: {}]   ;;  %s796_s5 = inlined_call_operand.hbm [shape: bf16[128,128], index: 5, kind: input, shape index: {}]   ;;  %s797_s6 = inlined_call_operand.vmem [shape: f32[1,128], index: 6, kind: input, shape index: {}]   ;;  %s798_s7 = inlined_call_operand.hbm [shape: f32[2,128], index: 7, kind: output, shape index: {}]  }
   0x1   :  { %13 = vsyncpa [#allocation6], 0 }
   0x2   :  { %14 = vsyncpa [#allocation9], 0 }
   0x3   :  { %15 = vsyncpa [#allocation4], 0  ;;  %s715_s24 = smov [#allocation5]  }
   0x4   :  { %s31_s25 = sshll.u32 %s715_s24, 4  ;;  %s32_s25 = int_to_ptr.vmem [resolvable:$true] %s31_s25 }
   0x5   :  { %s615_s26 = scalar_lea.vmem %s32_s25, 512  ;;  %p620_p1 = scmp.lt.s32.totalorder %s32_s25, %s32_s25 }
   0x6   :  { %p616_p0 = scmp.ne.s32.totalorder %s32_s25, %s615_s26  ;;  %p621_p2 = scmp.lt.s32.totalorder %s615_s26, %s615_s26 }
   0x8   :  { %p622_p3 = por %p621_p2, %p620_p1 }
   0xa   :  { %p623_p4 = pnand %p622_p3, %p616_p0 }
   0xc   :  { %626 = shalt.err (!%p623_p4)
}
   0xd   :  { %s716_s27 = smov 128   ;;  %s717_s28 = smov 8  }
   0xe   :  { %37 = dma.hbm_to_vmem [thread:$0]  %s792_s1, 512, %s32_s25, [#allocation6], %s716_s27, %s716_s27, %s717_s28  }
   0xf   :  { %s718_s8 = smov [#allocation2]   ;;  %s719_s10 = smov [#allocation7]  }
  0x10   :  { %s22_s9 = sshll.u32 %s718_s8, 4  ;;  %s45_s11 = sshll.u32 %s719_s10, 4  ;;  %s23_s9 = int_to_ptr.vmem [resolvable:$true] %s22_s9  ;;  %s46_s11 = int_to_ptr.vmem [resolvable:$true] %s45_s11 }
  0x11   :  { %s635_s12 = scalar_lea.vmem %s23_s9, 32  ;;  %p640_p6 = scmp.lt.s32.totalorder %s23_s9, %s23_s9 }
  0x12   :  { %p636_p5 = scmp.ne.s32.totalorder %s23_s9, %s635_s12  ;;  %p641_p7 = scmp.lt.s32.totalorder %s635_s12, %s635_s12 }
  0x14   :  { %p642_p8 = por %p641_p7, %p640_p6 }
  0x16   :  { %p643_p9 = pnand %p642_p8, %p636_p5 }
  0x18   :  { %646 = shalt.err (!%p643_p9)
}
  0x19   :  { %25 = dma.hbm_to_vmem [thread:$0]  %s791_s0, 32, %s23_s9, [#allocation3]  }
  0x1a   :  { %s655_s15 = scalar_lea.vmem %s46_s11, 2048  ;;  %p660_p11 = scmp.lt.s32.totalorder %s46_s11, %s46_s11 }
  0x1b   :  { %p656_p10 = scmp.ne.s32.totalorder %s46_s11, %s655_s15  ;;  %p661_p12 = scmp.lt.s32.totalorder %s655_s15, %s655_s15 }
  0x1d   :  { %p662_p13 = por %p661_p12, %p660_p11 }
  0x1f   :  { %p663_p0 = pnand %p662_p13, %p656_p10 }
  0x21   :  { %666 = shalt.err (!%p663_p0)
}
  0x22   :  { %s720_s1 = smov 64   ;;  %s721_s16 = smov 4  }
  0x23   :  { %51 = dma.hbm_to_vmem [thread:$0]  %s794_s3, 2048, %s46_s11, [#allocation6], %s720_s1, %s720_s1, %s721_s16  }
  0x24   :  { %s722_s19 = smov [#allocation8]  }
  0x25   :  { %s59_s20 = sshll.u32 %s722_s19, 4  ;;  %s60_s20 = int_to_ptr.vmem [resolvable:$true] %s59_s20 }
  0x26   :  { %s675_s21 = scalar_lea.vmem %s60_s20, 1024  ;;  %p680_p2 = scmp.lt.s32.totalorder %s60_s20, %s60_s20 }
  0x27   :  { %p676_p1 = scmp.ne.s32.totalorder %s60_s20, %s675_s21  ;;  %p681_p3 = scmp.lt.s32.totalorder %s675_s21, %s675_s21 }
  0x29   :  { %p682_p4 = por %p681_p3, %p680_p2 }
  0x2b   :  { %p683_p5 = pnand %p682_p4, %p676_p1 }
  0x2d   :  { %686 = shalt.err (!%p683_p5)
}
  0x2e   :  { %65 = dma.hbm_to_vmem [thread:$0]  %s796_s5, 1024, %s60_s20, [#allocation9], %s720_s1, %s720_s1, %s721_s16  }
  0x2f   :  { %707 = dma.done.wait [#allocation3], 32  }
  0x30   :  { %708 = vsyncadd [#allocation3], 4294967264 }
  0x31   :  { %709 = dma.done.wait [#allocation6], 2560  }
  0x32   :  { %710 = vsyncadd [#allocation6], 4294964736 }
  0x33   :  { %711 = dma.done.wait [#allocation9], 1024  }
  0x34   :  { %712 = vsyncadd [#allocation9], 4294966272  ;;  %v723_v0 = vmov 0   ;;  %vm121_vm0 = vcmask 1045504   ;;  %v578_v3 = vld [vmem:[#allocation5 + $0x4] ss:$8 sps:$4 sm:$0xff]   ;;  %v89_v30 = vlaneseq }
  0x35   :  { %160 = vmatprep.mubr.bf16.mxu0 %v723_v0  ;;  %v575_v1 = vld [vmem:[#allocation5 + $0x14] ss:$8 sps:$4 sm:$0x3f]   ;;  %v577_v2 = vld [vmem:[#allocation5 + $0x10] ss:$8 sps:$4 sm:$0x3f]  }
  0x36   :  { %484 = vmatprep.subr.msk.bf16.mxu0 %vm121_vm0, %v575_v1  ;;  %v580_v4 = vld [vmem:[#allocation5] ss:$8 sps:$4 sm:$0xff]   ;;  %v81_v5 = vld [vmem:[#allocation2] sm:$0x3]  ;;  %v123_v6 = vsel %vm121_vm0, %v577_v2, 0  ;;  %v583_v9 = vld [vmem:[#allocation7 + $0x70] sm:$0xff]  }
  0x37   :  { %v581_v7 = vld [vmem:[#allocation7 + $0x78] sm:$0xff]   ;;  %141 = vmatpush1.bf16.msra.mxu0 %v123_v6  ;;  %v584_v10 = vld [vmem:[#allocation7 + $0x30] sm:$0xff]   ;;  %v82_v11 = vpack.c.bf16 %v81_v5, %v81_v5  ;;  %v585_v12 = vld [vmem:[#allocation7 + $0x68] sm:$0xff]   ;;  %vm117_vm1 = vcmask 228352   ;;  %v724_v25 = vmov 0.0   ;;  %v90_v31 = vshrl.u32 %v89_v30, 7 }
  0x38   :  { %v582_v8 = vld [vmem:[#allocation7 + $0x38] sm:$0xff]   ;;  %142 = vmatprep.subr.bf16.mxu0 %v578_v3  ;;  %512 = vmatprep.subr.bf16.mxu1 %v581_v7  ;;  %v586_v13 = vld [vmem:[#allocation7 + $0x28] sm:$0xff]   ;;  %v587_v14 = vld [vmem:[#allocation7 + $0x60] sm:$0xff]   ;;  %vm725_vm2 = vmmov 0   ;;  %s726_s26 = smov [#allocation10]  }
  0x39   :  { %513 = vmatpush3.bf16.msra.mxu1 %v582_v8  ;;  %v588_v15 = vld [vmem:[#allocation7 + $0x20] sm:$0xff]   ;;  %v589_v16 = vld [vmem:[#allocation7 + $0x58] sm:$0xff]   ;;  %v591_v18 = vld [vmem:[#allocation7 + $0x50] sm:$0xff]   ;;  %v91_v32 = vsub.s32 0, %v90_v31  ;;  %v95_v34 = vsub.s32 1, %v90_v31 }
  0x3a   :  { %514 = vmatprep.subr.bf16.mxu1 %v583_v9  ;;  %v590_v17 = vld [vmem:[#allocation7 + $0x18] sm:$0xff]   ;;  %v592_v19 = vld [vmem:[#allocation7 + $0x10] sm:$0xff]   ;;  %v593_v20 = vld [vmem:[#allocation7 + $0x48] sm:$0xff]  }
  0x3b   :  { %143 = vmatpush1.bf16.msra.mxu0 %v580_v4  ;;  %v594_v21 = vld [vmem:[#allocation7 + $0x8] sm:$0xff]   ;;  %v595_v22 = vld [vmem:[#allocation7 + $0x40] sm:$0xff]   ;;  %v597_v24 = vld [vmem:[#allocation8 + $0x38] sm:$0xff]  }
  0x3c   :  { %v596_v23 = vld [vmem:[#allocation7] sm:$0xff]   ;;  %543 = vmatprep.subr.bf16.mxu0 %v724_v25  ;;  %v598_v26 = vld [vmem:[#allocation8 + $0x30] sm:$0xff]   ;;  %v599_v27 = vld [vmem:[#allocation8 + $0x28] sm:$0xff]  }
  0x3d   :  { %515 = vmatpush3.bf16.msra.mxu1 %v584_v10  ;;  %v600_v28 = vld [vmem:[#allocation8 + $0x20] sm:$0xff]   ;;  %v601_v29 = vld [vmem:[#allocation8 + $0x18] sm:$0xff]   ;;  %v602_v47 = vld [vmem:[#allocation8 + $0x10] sm:$0xff]  }
  0x3e   :  { %485 = vmatmul.mubr.msk.bf16.vlgmr.msra.gmra.mxu0 %vm117_vm1, %v82_v11  ;;  %516 = vmatprep.subr.bf16.mxu1 %v585_v12  ;;  %v87_v33 = vld [vmem:[%s793_s2] sm:$0x3]  ;;  %v603_v48 = vld [vmem:[#allocation8 + $0x8] sm:$0xff]   ;;  %v604_v49 = vld [vmem:[#allocation8] sm:$0xff]  }
  0x3f   :  { %544 = vmatpush3.bf16.msra.mxu0 %v597_v24  ;;  %v92_v35 = vrot.slane %v87_v33, %v91_v32  ;;  %v96_v36 = vrot.slane %v87_v33, %v95_v34  ;;  %559 = vmatprep.mubr.msk.bf16.mxu0 %vm725_vm2, %v724_v25  ;;  %v486_v51 = vld [vmem:[%s795_s4] ss:$0 sm:$0xff]  ;;  %s469_s4 = sshll.u32 %s726_s26, 4  ;;  %s470_s4 = int_to_ptr.vmem [resolvable:$true] %s469_s4 }
  0x40   :  { %545 = vmatprep.subr.bf16.mxu0 %v724_v25  ;;  %v503_v59 = vld [vmem:[%s797_s6] ss:$0 sm:$0xff]  ;;  %s687_s27 = scalar_lea.vmem %s470_s4, 32  ;;  %p692_p7 = scmp.lt.s32.totalorder %s470_s4, %s470_s4 }
  0x41   :  { %517 = vmatpush3.bf16.msra.mxu1 %v586_v13  ;;  %p688_p6 = scmp.ne.s32.totalorder %s470_s4, %s687_s27  ;;  %p693_p8 = scmp.lt.s32.totalorder %s687_s27, %s687_s27 }
  0x42   :  { %518 = vmatprep.subr.bf16.mxu1 %v587_v14 }
  0x43   :  { %546 = vmatpush3.bf16.msra.mxu0 %v598_v26  ;;  %p694_p9 = por %p693_p8, %p692_p7 }
  0x44   :  { %547 = vmatprep.subr.bf16.mxu0 %v724_v25 }
  0x45   :  { %519 = vmatpush3.bf16.msra.mxu1 %v588_v15  ;;  %p695_p10 = pnand %p694_p9, %p688_p6 }
  0x46   :  { %520 = vmatprep.subr.bf16.mxu1 %v589_v16 }
  0x47   :  { %548 = vmatpush3.bf16.msra.mxu0 %v599_v27 }
  0x48   :  { %549 = vmatprep.subr.bf16.mxu0 %v724_v25 }
  0x49   :  { %521 = vmatpush3.bf16.msra.mxu1 %v590_v17 }
  0x4a   :  { %522 = vmatprep.subr.bf16.mxu1 %v591_v18 }
  0x4b   :  { %550 = vmatpush3.bf16.msra.mxu0 %v600_v28 }
  0x4c   :  { %551 = vmatprep.subr.bf16.mxu0 %v724_v25 }
  0x4d   :  { %523 = vmatpush3.bf16.msra.mxu1 %v592_v19 }
  0x4e   :  { %524 = vmatprep.subr.bf16.mxu1 %v593_v20 }
  0x4f   :  { %552 = vmatpush3.bf16.msra.mxu0 %v601_v29 }
  0x50   :  { %553 = vmatprep.subr.bf16.mxu0 %v724_v25 }
  0x51   :  { %525 = vmatpush3.bf16.msra.mxu1 %v594_v21 }
  0x52   :  { %526 = vmatprep.subr.bf16.mxu1 %v595_v22 }
  0x53   :  { %554 = vmatpush3.bf16.msra.mxu0 %v602_v47 }
  0x54   :  { %555 = vmatprep.subr.bf16.mxu0 %v724_v25 }
  0x55   :  { %527 = vmatpush3.bf16.msra.mxu1 %v596_v23 }
  0x57   :  { %556 = vmatpush3.bf16.msra.mxu0 %v603_v48 }
  0x58   :  { %557 = vmatprep.subr.bf16.mxu0 %v724_v25 }
  0x5b   :  { %558 = vmatpush3.bf16.msra.mxu0 %v604_v49 }
  0xfe   :  { %v162_v37 = vpop.f32.mrf.mxu0 }
  0xff   :  { %v163_v38 = vadd.f32 %v162_v37, %v92_v35 }
 0x100   :  { %v164_v39 = vpop.f32.mrf.mxu0 }
 0x101   :  { %v165_v40 = vadd.f32 %v164_v39, %v96_v36  ;;  %v169_v41 = vmax.f32 %v163_v38, 0.0 }
 0x102   :  { %v166_v42 = vpop.f32.mrf.mxu0 }
 0x103   :  { %v170_v43 = vmax.f32 %v165_v40, 0.0  ;;  %v171_v46 = vpack.c.bf16 %v169_v41, %v169_v41 }
 0x104   :  { %v167_v44 = vpop.f32.mrf.mxu0 }
 0x105   :  { %v172_v45 = vpack.c.bf16 %v170_v43, %v170_v43 }
 0x107   :  { %340 = vmatprep.mubr.bf16.mxu1 %v172_v45 }
 0x108   :  { %341 = vmatmul.mubr.bf16.vlgmr.msra.gmra.mxu1 %v171_v46 }
 0x1c8   :  { %v528_v50 = vpop.f32.mrf.mxu1 }
 0x1ca   :  { %v529_v52 = vpop.f32.mrf.mxu1 }
 0x1cb   :  { %v530_v53 = vadd.f32 %v529_v52, %v528_v50 }
 0x1cc   :  { %v531_v54 = vpop.f32.mrf.mxu1 }
 0x1cd   :  { %v343_v55 = vadd.f32 %v530_v53, %v486_v51 }
 0x1ce   :  { %v532_v56 = vpop.f32.mrf.mxu1 }
 0x1cf   :  { %v348_v57 = vmax.f32 %v343_v55, 0.0 }
 0x1d1   :  { %v349_v58 = vpack.c.bf16 %v348_v57, %v348_v57 }
 0x1d3   :  { %560 = vmatmul.mubr.bf16.vlgmr.msra.gmra.mxu0 %v349_v58 }
 0x293   :  { %v455_v60 = vpop.f32.mrf.mxu0 }
 0x294   :  { %v456_v61 = vadd.f32 %v503_v59, %v455_v60 }
 0x295   :  { %v561_v62 = vpop.f32.mrf.mxu0 }
 0x296   :  { %605 = vtanh.f32 %v456_v61 }
 0x297   :  { %v458_v63 = vpop.f32.mrf.mxu0 }
 0x299   :  { %v562_v0 = vpop.f32.mrf.mxu0 }
 0x2a3   :  { %v606_v1 = vpop.eup %605 }
 0x2a4   :  { %462 = vst [vmem:[#allocation10] sm:$0x3] %v606_v1 }
 0x2a5   :  { %698 = shalt.err (!%p695_p10)
}
 0x2a6   :  { %472 = dma.vmem_to_hbm [thread:$0]  %s470_s4, 32, %s798_s7, [#allocation4]  }
 0x2a7   :  { %713 = dma.done.wait [#allocation4], 32  }
 0x2a8   :  { %714 = vsyncadd [#allocation4], 4294967264 }
 0x2a9   :  { %476 = vsyncpa [#allocation3], 1 }
 0x2aa   :  { %477 = vsyncpa [#allocation6], 1 }
 0x2ab   :  { %478 = vsyncpa [#allocation9], 1 }
 0x2ac   :  { %479 = vsyncpa [#allocation4], 1 }

</bundles_post_ra>
